<compile_context>
chip_gen: v6e
topology: v6e:2x2x1
jax: 0.10.0
libtpu: 0.0.40
codegen_flags: <defaults>
</compile_context>

<pallas_src>
import functools

import jax
import jax.numpy as jnp
from jax.experimental import pallas as pl
from jax.experimental.pallas import tpu as pltpu

LANE = 128      # vreg lane width
SUBLANE = 8     # vreg sublane count (f32)


def _round_up(x: int, m: int) -> int:
    return ((x + m - 1) // m) * m


# ---------------------------------------------------------------------------
# Fused kernel: whole MLP in one body.
# ---------------------------------------------------------------------------
def _mlp_fused_kernel(x_ref, w_ref, b_ref, o_ref, *, n_layers: int):
    """x_ref: (B_pad, D_pad)  w_ref: (L, D_pad, D_pad)  b_ref: (L, 1, D_pad)."""
    y = x_ref[...]
    # Static Python loop over layers (L is tiny / compile-time constant).
    # Intermediate activations never leave on-chip memory.
    for i in range(n_layers):
        # Weights are stored pre-transposed as (in, out): contraction on the
        # sublane axis of y and the leading axis of W -> straight MXU matmul,
        # no in-kernel transpose (XLU) needed.
        y = jnp.dot(y, w_ref[i], preferred_element_type=jnp.float32)
        y = y + b_ref[i]                      # (1, D_pad) broadcasts over batch
        if i < n_layers - 1:
            y = jnp.maximum(y, 0.0)           # ReLU after every layer but last
    o_ref[...] = y.astype(o_ref.dtype)


# ---------------------------------------------------------------------------
# Parameter prep: PyTorch-layout params -> padded, transposed, stacked tensors.
# Done ONCE, outside the forward pass.
# ---------------------------------------------------------------------------
def prepare_mlp_params(params):
    """params: list of (w (out,in), b (out,)) in PyTorch nn.Linear layout.

    Returns (w_stack (L, D_pad, D_pad), b_stack (L, 1, D_pad), d_pad) with
    weights transposed to (in, out) and zero-padded to a common lane-aligned
    width D_pad = round_up(max feature dim, 128)."""
    dims = [params[0][0].shape[1]] + [w.shape[0] for w, _ in params]
    d_pad = _round_up(max(dims), LANE)

    w_stack, b_stack = [], []
    for w, b in params:
        out_dim, in_dim = w.shape
        w_t = jnp.zeros((d_pad, d_pad), jnp.float32).at[:in_dim, :out_dim].set(w.T)
        b_p = jnp.zeros((1, d_pad), jnp.float32).at[0, :out_dim].set(b)
        w_stack.append(w_t)
        b_stack.append(b_p)
    return jnp.stack(w_stack), jnp.stack(b_stack), d_pad


# ---------------------------------------------------------------------------
# Forward: single fused pallas_call.
# ---------------------------------------------------------------------------
@functools.partial(jax.jit, static_argnames=("out_dim",))
def mlp_forward_fused(x, w_stack, b_stack, out_dim):
    B, in_dim = x.shape
    L, d_pad, _ = w_stack.shape
    b_pad = _round_up(max(B, SUBLANE), SUBLANE)

    # Pad the input once; padded lanes are zero and stay inert through every
    # layer (padded weight rows are zero).
    x_p = jnp.zeros((b_pad, d_pad), jnp.float32).at[:B, :in_dim].set(x)

    kernel = functools.partial(_mlp_fused_kernel, n_layers=L)

    flops = 2 * b_pad * d_pad * d_pad * L
    bytes_accessed = 4 * (x_p.size + w_stack.size + b_stack.size + b_pad * d_pad)

    y_p = pl.pallas_call(
        kernel,
        out_shape=jax.ShapeDtypeStruct((b_pad, d_pad), jnp.float32),
        in_specs=[
            pl.BlockSpec((b_pad, d_pad), lambda: (0, 0)),
            pl.BlockSpec((L, d_pad, d_pad), lambda: (0, 0, 0)),
            pl.BlockSpec((L, 1, d_pad), lambda: (0, 0, 0)),
        ],
        out_specs=pl.BlockSpec((b_pad, d_pad), lambda: (0, 0)),
        compiler_params=pltpu.CompilerParams(
            vmem_limit_bytes=32 * 1024 * 1024,
        ),
        cost_estimate=pl.CostEstimate(
            flops=flops, transcendentals=0, bytes_accessed=bytes_accessed),
    )(x_p, w_stack, b_stack)

    # Slice back to the true (B, out_dim) only at the very end.
    return y_p[:B, :out_dim]


# ---------------------------------------------------------------------------
# PyTorch-like init (uniform +-1/sqrt(fan_in)), kept in nn.Linear layout so
# the pure-JAX reference below is a faithful port of the module.
# ---------------------------------------------------------------------------
def init_mlp_params(key, input_dim, output_dim, hidden_dims):
    params = []
    dims_in = input_dim
    for d_out in list(hidden_dims) + [output_dim]:
        key, kw, kb = jax.random.split(key, 3)
        bound = 1.0 / jnp.sqrt(jnp.float32(dims_in))
        w = jax.random.uniform(kw, (d_out, dims_in), jnp.float32, -bound, bound)
        b = jax.random.uniform(kb, (d_out,), jnp.float32, -bound, bound)
        params.append((w, b))
        dims_in = d_out
    return params


if __name__ == "__main__":
    # MLP(input_dim=32, output_dim=16, hidden_dims=[64, 32]) on a (8, 32) input.
    batch = 8
    input_dim = 32
    output_dim = 16
    hidden_dims = [64, 32]

    key = jax.random.PRNGKey(0)
    key, kx = jax.random.split(key)
    x = jax.random.normal(kx, (batch, input_dim), jnp.float32)

    params = init_mlp_params(key, input_dim, output_dim, hidden_dims)

    # One-time prep: transpose + lane-pad + stack the weights.
    w_stack, b_stack, _ = prepare_mlp_params(params)

    y = mlp_forward_fused(x, w_stack, b_stack, output_dim)
    jax.block_until_ready(y)

    # Pure-JAX reference (original unpadded params, original math).
    y_ref = x
    for i, (w, b) in enumerate(params):
        y_ref = y_ref @ w.T + b
        if i < len(params) - 1:
            y_ref = jnp.maximum(y_ref, 0.0)

    assert y.shape == (batch, output_dim)
    assert jnp.allclose(y, y_ref, atol=1e-5, rtol=1e-5)

    print("KERNEL_OK")
</pallas_src>

<mosaic_0001>
module attributes {stable_mosaic.version = 11 : i64} {
  func.func @_mlp_fused_kernel(%arg0: memref<8x128xf32, #tpu.memory_space<vmem>>, %arg1: memref<3x128x128xf32, #tpu.memory_space<vmem>>, %arg2: memref<3x1x128xf32, #tpu.memory_space<vmem>>, %arg3: memref<8x128xf32, #tpu.memory_space<vmem>>) attributes {dimension_semantics = [], scalar_prefetch = 0 : i64, scratch_operands = 0 : i64, tpu.core_type = #tpu.core_type<tc>} {
    %c0 = arith.constant 0 : index
    %c0_0 = arith.constant 0 : index
    %0 = vector.load %arg0[%c0, %c0_0] : memref<8x128xf32, #tpu.memory_space<vmem>>, vector<8x128xf32>
    %c0_1 = arith.constant 0 : index
    %c0_2 = arith.constant 0 : index
    %c0_3 = arith.constant 0 : index
    %1 = vector.load %arg1[%c0_1, %c0_2, %c0_3] : memref<3x128x128xf32, #tpu.memory_space<vmem>>, vector<1x128x128xf32>
    %2 = vector.shape_cast %1 : vector<1x128x128xf32> to vector<128x128xf32>
    %cst = arith.constant dense<0.000000e+00> : vector<8x128xf32>
    %3 = tpu.matmul %0, %2, %cst {dimension_numbers = #tpu.dot_dimension_numbers<[1], [0], [0], [1], [0, 0, 1, 1], [], []>} : vector<8x128xf32>, vector<128x128xf32>, vector<8x128xf32> -> vector<8x128xf32>
    %c0_4 = arith.constant 0 : index
    %c0_5 = arith.constant 0 : index
    %c0_6 = arith.constant 0 : index
    %4 = vector.load %arg2[%c0_4, %c0_5, %c0_6] : memref<3x1x128xf32, #tpu.memory_space<vmem>>, vector<1x1x128xf32>
    %5 = vector.shape_cast %4 : vector<1x1x128xf32> to vector<1x128xf32>
    %6 = vector.broadcast %5 : vector<1x128xf32> to vector<8x128xf32>
    %7 = arith.addf %3, %6 : vector<8x128xf32>
    %cst_7 = arith.constant 0.000000e+00 : f32
    %8 = vector.broadcast %cst_7 : f32 to vector<8x128xf32>
    %9 = arith.maximumf %7, %8 : vector<8x128xf32>
    %c1 = arith.constant 1 : index
    %c0_8 = arith.constant 0 : index
    %c0_9 = arith.constant 0 : index
    %10 = vector.load %arg1[%c1, %c0_8, %c0_9] : memref<3x128x128xf32, #tpu.memory_space<vmem>>, vector<1x128x128xf32>
    %11 = vector.shape_cast %10 : vector<1x128x128xf32> to vector<128x128xf32>
    %cst_10 = arith.constant dense<0.000000e+00> : vector<8x128xf32>
    %12 = tpu.matmul %9, %11, %cst_10 {dimension_numbers = #tpu.dot_dimension_numbers<[1], [0], [0], [1], [0, 0, 1, 1], [], []>} : vector<8x128xf32>, vector<128x128xf32>, vector<8x128xf32> -> vector<8x128xf32>
    %c1_11 = arith.constant 1 : index
    %c0_12 = arith.constant 0 : index
    %c0_13 = arith.constant 0 : index
    %13 = vector.load %arg2[%c1_11, %c0_12, %c0_13] : memref<3x1x128xf32, #tpu.memory_space<vmem>>, vector<1x1x128xf32>
    %14 = vector.shape_cast %13 : vector<1x1x128xf32> to vector<1x128xf32>
    %15 = vector.broadcast %14 : vector<1x128xf32> to vector<8x128xf32>
    %16 = arith.addf %12, %15 : vector<8x128xf32>
    %cst_14 = arith.constant 0.000000e+00 : f32
    %17 = vector.broadcast %cst_14 : f32 to vector<8x128xf32>
    %18 = arith.maximumf %16, %17 : vector<8x128xf32>
    %c2 = arith.constant 2 : index
    %c0_15 = arith.constant 0 : index
    %c0_16 = arith.constant 0 : index
    %19 = vector.load %arg1[%c2, %c0_15, %c0_16] : memref<3x128x128xf32, #tpu.memory_space<vmem>>, vector<1x128x128xf32>
    %20 = vector.shape_cast %19 : vector<1x128x128xf32> to vector<128x128xf32>
    %cst_17 = arith.constant dense<0.000000e+00> : vector<8x128xf32>
    %21 = tpu.matmul %18, %20, %cst_17 {dimension_numbers = #tpu.dot_dimension_numbers<[1], [0], [0], [1], [0, 0, 1, 1], [], []>} : vector<8x128xf32>, vector<128x128xf32>, vector<8x128xf32> -> vector<8x128xf32>
    %c2_18 = arith.constant 2 : index
    %c0_19 = arith.constant 0 : index
    %c0_20 = arith.constant 0 : index
    %22 = vector.load %arg2[%c2_18, %c0_19, %c0_20] : memref<3x1x128xf32, #tpu.memory_space<vmem>>, vector<1x1x128xf32>
    %23 = vector.shape_cast %22 : vector<1x1x128xf32> to vector<1x128xf32>
    %24 = vector.broadcast %23 : vector<1x128xf32> to vector<8x128xf32>
    %25 = arith.addf %21, %24 : vector<8x128xf32>
    %c0_21 = arith.constant 0 : index
    %c0_22 = arith.constant 0 : index
    %26 = vector.load %arg3[%c0_21, %c0_22] : memref<8x128xf32, #tpu.memory_space<vmem>>, vector<8x128xf32>
    tpu.vector_store %arg3[%c0_21, %c0_22], %25 {strides = array<i32>} : memref<8x128xf32, #tpu.memory_space<vmem>>, vector<8x128xf32>,
    return
  }
}

</mosaic_0001>

<bundles_post_ra>
// kernel: mlp_forward_fused.1
= control target key start
LH: loop header
LB: loop body
LE: loop exit
PB: predicated region body
PF: predicated region fallthrough
CT: control target
= control target key end

     0   :  { %8 = vsyncpa [#allocation3], 0  ;;  %s640_s0 = inlined_call_operand.vmem [shape: f32[8,128], index: 0, kind: input, shape index: {}]   ;;  %s641_s1 = inlined_call_operand.hbm [shape: f32[3,128,128], index: 1, kind: input, shape index: {}]   ;;  %s642_s2 = inlined_call_operand.vmem [shape: f32[3,1,128], index: 2, kind: input, shape index: {}]   ;;  %s643_s3 = inlined_call_operand.hbm [shape: f32[8,128], index: 3, kind: output, shape index: {}]  }
   0x1   :  { %9 = vsyncpa [#allocation4], 0  ;;  %s542_s12 = smov [#allocation2]  }
   0x2   :  { %s17_s13 = sshll.u32 %s542_s12, 4  ;;  %s18_s13 = int_to_ptr.vmem [resolvable:$true] %s17_s13 }
   0x3   :  { %s506_s14 = scalar_lea.vmem %s18_s13, 6144  ;;  %p511_p1 = scmp.lt.s32.totalorder %s18_s13, %s18_s13 }
   0x4   :  { %p507_p0 = scmp.ne.s32.totalorder %s18_s13, %s506_s14  ;;  %p512_p2 = scmp.lt.s32.totalorder %s506_s14, %s506_s14 }
   0x6   :  { %p513_p3 = por %p512_p2, %p511_p1 }
   0x8   :  { %p514_p4 = pnand %p513_p3, %p507_p0 }
   0xa   :  { %517 = shalt.err (!%p514_p4)
}
   0xb   :  { %s543_s15 = smov 128   ;;  %s544_s16 = smov 8  }
   0xc   :  { %23 = dma.hbm_to_vmem [thread:$0]  %s641_s1, 6144, %s18_s13, [#allocation3], %s543_s15, %s543_s15, %s544_s16  }
   0xd   :  { %538 = dma.done.wait [#allocation3], 6144  }
   0xe   :  { %539 = vsyncadd [#allocation3], 4294961152  ;;  %v545_v0 = vmov 0.0   ;;  %vm546_vm0 = vmmov 0   ;;  %v45_v1 = vld [vmem:[#allocation2 + $0x78] sm:$0xff]  ;;  %v44_v2 = vld [vmem:[#allocation2 + $0x70] sm:$0xff] }
   0xf   :  { %387 = vmatprep.subr.mxu0 %v545_v0  ;;  %419 = vmatprep.mubr.msk.f32.mxu0 %vm546_vm0, %v545_v0  ;;  %v43_v3 = vld [vmem:[#allocation2 + $0x68] sm:$0xff]  ;;  %v42_v4 = vld [vmem:[#allocation2 + $0x60] sm:$0xff]  ;;  %v140_v5 = vld [vmem:[#allocation2 + $0xf8] sm:$0xff]  ;;  %s547_s25 = smov [#allocation5]  }
  0x10   :  { %422 = vmatprep.subr.mxu1 %v545_v0  ;;  %454 = vmatprep.mubr.msk.f32.mxu1 %vm546_vm0, %v545_v0  ;;  %v41_v6 = vld [vmem:[#allocation2 + $0x58] sm:$0xff]  ;;  %v139_v7 = vld [vmem:[#allocation2 + $0xf0] sm:$0xff]  ;;  %v138_v8 = vld [vmem:[#allocation2 + $0xe8] sm:$0xff]  ;;  %s322_s26 = sshll.u32 %s547_s25, 4  ;;  %s323_s26 = int_to_ptr.vmem [resolvable:$true] %s322_s26 }
  0x11   :  { %388 = vmatpush3.msra.mxu0 %v45_v1  ;;  %423 = vmatpush3.msra.mxu1 %v140_v5  ;;  %v40_v9 = vld [vmem:[#allocation2 + $0x50] sm:$0xff]  ;;  %v137_v10 = vld [vmem:[#allocation2 + $0xe0] sm:$0xff]  ;;  %v39_v11 = vld [vmem:[#allocation2 + $0x48] sm:$0xff]  ;;  %s518_s27 = scalar_lea.vmem %s323_s26, 128  ;;  %p523_p6 = scmp.lt.s32.totalorder %s323_s26, %s323_s26 }
  0x12   :  { %389 = vmatprep.subr.mxu0 %v545_v0  ;;  %424 = vmatprep.subr.mxu1 %v545_v0  ;;  %v136_v12 = vld [vmem:[#allocation2 + $0xd8] sm:$0xff]  ;;  %v38_v13 = vld [vmem:[#allocation2 + $0x40] sm:$0xff]  ;;  %v135_v14 = vld [vmem:[#allocation2 + $0xd0] sm:$0xff]  ;;  %p519_p5 = scmp.ne.s32.totalorder %s323_s26, %s518_s27  ;;  %p524_p7 = scmp.lt.s32.totalorder %s518_s27, %s518_s27 }
  0x13   :  { %390 = vmatpush3.msra.mxu0 %v44_v2  ;;  %425 = vmatpush3.msra.mxu1 %v139_v7  ;;  %v37_v15 = vld [vmem:[#allocation2 + $0x38] sm:$0xff]  ;;  %v134_v16 = vld [vmem:[#allocation2 + $0xc8] sm:$0xff]  ;;  %v36_v17 = vld [vmem:[#allocation2 + $0x30] sm:$0xff] }
  0x14   :  { %391 = vmatprep.subr.mxu0 %v545_v0  ;;  %426 = vmatprep.subr.mxu1 %v545_v0  ;;  %v133_v18 = vld [vmem:[#allocation2 + $0xc0] sm:$0xff]  ;;  %v35_v19 = vld [vmem:[#allocation2 + $0x28] sm:$0xff]  ;;  %v132_v20 = vld [vmem:[#allocation2 + $0xb8] sm:$0xff]  ;;  %p525_p8 = por %p524_p7, %p523_p6 }
  0x15   :  { %392 = vmatpush3.msra.mxu0 %v43_v3  ;;  %427 = vmatpush3.msra.mxu1 %v138_v8  ;;  %v34_v21 = vld [vmem:[#allocation2 + $0x20] sm:$0xff]  ;;  %v131_v22 = vld [vmem:[#allocation2 + $0xb0] sm:$0xff]  ;;  %v33_v23 = vld [vmem:[#allocation2 + $0x18] sm:$0xff] }
  0x16   :  { %393 = vmatprep.subr.mxu0 %v545_v0  ;;  %428 = vmatprep.subr.mxu1 %v545_v0  ;;  %v130_v24 = vld [vmem:[#allocation2 + $0xa8] sm:$0xff]  ;;  %v32_v25 = vld [vmem:[#allocation2 + $0x10] sm:$0xff]  ;;  %v129_v26 = vld [vmem:[#allocation2 + $0xa0] sm:$0xff]  ;;  %p526_p9 = pnand %p525_p8, %p519_p5 }
  0x17   :  { %394 = vmatpush3.msra.mxu0 %v42_v4  ;;  %429 = vmatpush3.msra.mxu1 %v137_v10  ;;  %v31_v27 = vld [vmem:[#allocation2 + $0x8] sm:$0xff]  ;;  %v128_v28 = vld [vmem:[#allocation2 + $0x98] sm:$0xff]  ;;  %v30_v29 = vld [vmem:[#allocation2] sm:$0xff] }
  0x18   :  { %395 = vmatprep.subr.mxu0 %v545_v0  ;;  %430 = vmatprep.subr.mxu1 %v545_v0  ;;  %v29_v30 = vld [vmem:[%s640_s0] sm:$0xff]  ;;  %v127_v31 = vld [vmem:[#allocation2 + $0x90] sm:$0xff]  ;;  %v126_v32 = vld [vmem:[#allocation2 + $0x88] sm:$0xff] }
  0x19   :  { %396 = vmatpush3.msra.mxu0 %v41_v6  ;;  %431 = vmatpush3.msra.mxu1 %v136_v12  ;;  %v125_v33 = vld [vmem:[#allocation2 + $0x80] sm:$0xff]  ;;  %v236_v34 = vld [vmem:[#allocation2 + $0x178] sm:$0xff]  ;;  %v235_v35 = vld [vmem:[#allocation2 + $0x170] sm:$0xff] }
  0x1a   :  { %397 = vmatprep.subr.mxu0 %v545_v0  ;;  %432 = vmatprep.subr.mxu1 %v545_v0  ;;  %v234_v36 = vld [vmem:[#allocation2 + $0x168] sm:$0xff]  ;;  %v233_v37 = vld [vmem:[#allocation2 + $0x160] sm:$0xff]  ;;  %v232_v38 = vld [vmem:[#allocation2 + $0x158] sm:$0xff] }
  0x1b   :  { %398 = vmatpush3.msra.mxu0 %v40_v9  ;;  %433 = vmatpush3.msra.mxu1 %v135_v14  ;;  %v231_v39 = vld [vmem:[#allocation2 + $0x150] sm:$0xff]  ;;  %v230_v40 = vld [vmem:[#allocation2 + $0x148] sm:$0xff]  ;;  %v229_v41 = vld [vmem:[#allocation2 + $0x140] sm:$0xff] }
  0x1c   :  { %399 = vmatprep.subr.mxu0 %v545_v0  ;;  %434 = vmatprep.subr.mxu1 %v545_v0  ;;  %v228_v42 = vld [vmem:[#allocation2 + $0x138] sm:$0xff]  ;;  %v227_v43 = vld [vmem:[#allocation2 + $0x130] sm:$0xff]  ;;  %v226_v44 = vld [vmem:[#allocation2 + $0x128] sm:$0xff] }
  0x1d   :  { %400 = vmatpush3.msra.mxu0 %v39_v11  ;;  %435 = vmatpush3.msra.mxu1 %v134_v16  ;;  %v225_v45 = vld [vmem:[#allocation2 + $0x120] sm:$0xff]  ;;  %v224_v46 = vld [vmem:[#allocation2 + $0x118] sm:$0xff]  ;;  %v223_v52 = vld [vmem:[#allocation2 + $0x110] sm:$0xff] }
  0x1e   :  { %401 = vmatprep.subr.mxu0 %v545_v0  ;;  %436 = vmatprep.subr.mxu1 %v545_v0  ;;  %v331_v47 = vld [vmem:[%s642_s2] ss:$0 sm:$0xff]  ;;  %v222_v53 = vld [vmem:[#allocation2 + $0x108] sm:$0xff]  ;;  %v333_v55 = vld [vmem:[%s642_s2 + $0x1] ss:$0 sm:$0xff] }
  0x1f   :  { %402 = vmatpush3.msra.mxu0 %v38_v13  ;;  %437 = vmatpush3.msra.mxu1 %v133_v18  ;;  %v221_v54 = vld [vmem:[#allocation2 + $0x100] sm:$0xff] }
  0x20   :  { %403 = vmatprep.subr.mxu0 %v545_v0  ;;  %438 = vmatprep.subr.mxu1 %v545_v0  ;;  %v335_v60 = vld [vmem:[%s642_s2 + $0x2] ss:$0 sm:$0xff] }
  0x21   :  { %404 = vmatpush3.msra.mxu0 %v37_v15  ;;  %439 = vmatpush3.msra.mxu1 %v132_v20 }
  0x22   :  { %405 = vmatprep.subr.mxu0 %v545_v0  ;;  %440 = vmatprep.subr.mxu1 %v545_v0 }
  0x23   :  { %406 = vmatpush3.msra.mxu0 %v36_v17  ;;  %441 = vmatpush3.msra.mxu1 %v131_v22 }
  0x24   :  { %407 = vmatprep.subr.mxu0 %v545_v0  ;;  %442 = vmatprep.subr.mxu1 %v545_v0 }
  0x25   :  { %408 = vmatpush3.msra.mxu0 %v35_v19  ;;  %443 = vmatpush3.msra.mxu1 %v130_v24 }
  0x26   :  { %409 = vmatprep.subr.mxu0 %v545_v0  ;;  %444 = vmatprep.subr.mxu1 %v545_v0 }
  0x27   :  { %410 = vmatpush3.msra.mxu0 %v34_v21  ;;  %445 = vmatpush3.msra.mxu1 %v129_v26 }
  0x28   :  { %411 = vmatprep.subr.mxu0 %v545_v0  ;;  %446 = vmatprep.subr.mxu1 %v545_v0 }
  0x29   :  { %412 = vmatpush3.msra.mxu0 %v33_v23  ;;  %447 = vmatpush3.msra.mxu1 %v128_v28 }
  0x2a   :  { %413 = vmatprep.subr.mxu0 %v545_v0  ;;  %448 = vmatprep.subr.mxu1 %v545_v0 }
  0x2b   :  { %414 = vmatpush3.msra.mxu0 %v32_v25  ;;  %449 = vmatpush3.msra.mxu1 %v127_v31 }
  0x2c   :  { %415 = vmatprep.subr.mxu0 %v545_v0  ;;  %450 = vmatprep.subr.mxu1 %v545_v0 }
  0x2d   :  { %416 = vmatpush3.msra.mxu0 %v31_v27  ;;  %451 = vmatpush3.msra.mxu1 %v126_v32 }
  0x2e   :  { %417 = vmatprep.subr.mxu0 %v545_v0  ;;  %452 = vmatprep.subr.mxu1 %v545_v0 }
  0x2f   :  { %418 = vmatpush3.msra.mxu0 %v30_v29  ;;  %453 = vmatpush3.msra.mxu1 %v125_v33 }
  0x30   :  { %420 = vmatmul.mubr.f32.vlgmr.msra.gmra.mxu0 %v29_v30  ;;  %457 = vmatprep.subr.mxu0 %v545_v0 }
  0x31   :  { %489 = vmatprep.mubr.msk.f32.mxu0 %vm546_vm0, %v545_v0  ;;  %458 = vmatpush3.msra.mxu0 %v236_v34 }
  0x32   :  { %459 = vmatprep.subr.mxu0 %v545_v0 }
  0x33   :  { %460 = vmatpush3.msra.mxu0 %v235_v35 }
  0x34   :  { %461 = vmatprep.subr.mxu0 %v545_v0 }
  0x35   :  { %462 = vmatpush3.msra.mxu0 %v234_v36 }
  0x36   :  { %463 = vmatprep.subr.mxu0 %v545_v0 }
  0x37   :  { %464 = vmatpush3.msra.mxu0 %v233_v37 }
  0x38   :  { %465 = vmatprep.subr.mxu0 %v545_v0 }
  0x39   :  { %466 = vmatpush3.msra.mxu0 %v232_v38 }
  0x3a   :  { %467 = vmatprep.subr.mxu0 %v545_v0 }
  0x3b   :  { %468 = vmatpush3.msra.mxu0 %v231_v39 }
  0x3c   :  { %469 = vmatprep.subr.mxu0 %v545_v0 }
  0x3d   :  { %470 = vmatpush3.msra.mxu0 %v230_v40 }
  0x3e   :  { %471 = vmatprep.subr.mxu0 %v545_v0 }
  0x3f   :  { %472 = vmatpush3.msra.mxu0 %v229_v41 }
  0x40   :  { %473 = vmatprep.subr.mxu0 %v545_v0 }
  0x41   :  { %474 = vmatpush3.msra.mxu0 %v228_v42 }
  0x42   :  { %475 = vmatprep.subr.mxu0 %v545_v0 }
  0x43   :  { %476 = vmatpush3.msra.mxu0 %v227_v43 }
  0x44   :  { %477 = vmatprep.subr.mxu0 %v545_v0 }
  0x45   :  { %478 = vmatpush3.msra.mxu0 %v226_v44 }
  0x46   :  { %479 = vmatprep.subr.mxu0 %v545_v0 }
  0x47   :  { %480 = vmatpush3.msra.mxu0 %v225_v45 }
  0x48   :  { %481 = vmatprep.subr.mxu0 %v545_v0 }
  0x49   :  { %482 = vmatpush3.msra.mxu0 %v224_v46 }
  0x4a   :  { %483 = vmatprep.subr.mxu0 %v545_v0 }
  0x4b   :  { %484 = vmatpush3.msra.mxu0 %v223_v52 }
  0x4c   :  { %485 = vmatprep.subr.mxu0 %v545_v0 }
  0x4d   :  { %486 = vmatpush3.msra.mxu0 %v222_v53 }
  0x4e   :  { %487 = vmatprep.subr.mxu0 %v545_v0 }
  0x4f   :  { %488 = vmatpush3.msra.mxu0 %v221_v54 }
  0xf0   :  { %v119_v48 = vpop.f32.mrf.mxu0 }
  0xf1   :  { %v120_v49 = vadd.f32 %v331_v47, %v119_v48 }
  0xf2   :  { %v421_v50 = vpop.f32.mrf.mxu0 }
  0xf3   :  { %v123_v51 = vmax.f32 %v120_v49, 0.0 }
  0xf5   :  { %455 = vmatmul.mubr.f32.vlgmr.msra.gmra.mxu1 %v123_v51 }
 0x1b5   :  { %v215_v56 = vpop.f32.mrf.mxu1 }
 0x1b6   :  { %v216_v57 = vadd.f32 %v333_v55, %v215_v56 }
 0x1b7   :  { %v456_v58 = vpop.f32.mrf.mxu1 }
 0x1b8   :  { %v219_v59 = vmax.f32 %v216_v57, 0.0 }
 0x1ba   :  { %490 = vmatmul.mubr.f32.vlgmr.msra.gmra.mxu0 %v219_v59 }
 0x27a   :  { %v311_v61 = vpop.f32.mrf.mxu0 }
 0x27b   :  { %v312_v62 = vadd.f32 %v335_v60, %v311_v61 }
 0x27c   :  { %v491_v63 = vpop.f32.mrf.mxu0 }
 0x27d   :  { %315 = vst [vmem:[#allocation5] sm:$0xff] %v312_v62 }
 0x27e   :  { %529 = shalt.err (!%p526_p9)
}
 0x27f   :  { %325 = dma.vmem_to_hbm [thread:$0]  %s323_s26, 128, %s643_s3, [#allocation4]  }
 0x280   :  { %540 = dma.done.wait [#allocation4], 128  }
 0x281   :  { %541 = vsyncadd [#allocation4], 4294967168 }
 0x282   :  { %329 = vsyncpa [#allocation3], 1 }
 0x283   :  { %330 = vsyncpa [#allocation4], 1 }

</bundles_post_ra>
